<compile_context>
chip_gen: v5e
topology: v5e:2x2
jax: 0.10.0
libtpu: 0.0.40
codegen_flags: <defaults>
</compile_context>

<pallas_src>
import jax
import jax.numpy as jnp
from jax.experimental import pallas as pl
from jax.experimental.pallas import tpu as pltpu

LANE = 128


def _round_up(n, m):
    return ((n + m - 1) // m) * m


def _pick_tile(L, tl_max=256):
    """Largest multiple of 8 that divides L and is <= tl_max; fall back to full L."""
    best = None
    for t in range(8, min(tl_max, L) + 1, 8):
        if L % t == 0:
            best = t
    return best if best is not None else L


def vqvae_kernel(xw_ref, wenc_ref, benc_ref, cb_ref, esq_ref, wdec_ref, bdec_ref,
                 recon_ref, zq_ref, z_ref, zq_scr):
    TL = recon_ref.shape[1]
    li = pl.program_id(1)
    nl = pl.num_programs(1)

    # ---- encoder: Conv1d(Cin -> D, k=3, same pad) as ONE matmul over the im2col'd window ----
    xw = xw_ref[0, 0]                                                   # (TL+2, C3p)
    E = cb_ref[...]                                                     # (Kp, Dp)
    z_h = (jnp.dot(xw, wenc_ref[...], preferred_element_type=jnp.float32)
           + benc_ref[...])                                             # (TL+2, Dp) f32

    # ---- vector quantizer: nearest codebook row (L2); distances & argmin in f32 ----
    zc = z_h.astype(E.dtype)
    z_sq = jnp.sum(z_h * z_h, axis=-1, keepdims=True)                   # (TL+2, 1)
    cross = jax.lax.dot_general(zc, E, (((1,), (1,)), ((), ())),
                                preferred_element_type=jnp.float32)     # (TL+2, Kp) = z @ E^T
    d = z_sq - 2.0 * cross + esq_ref[...]                               # (TL+2, Kp)
    Kp = d.shape[-1]
    iota_k = jax.lax.broadcasted_iota(jnp.int32, d.shape, 1)
    dmin = jnp.min(d, axis=-1, keepdims=True)
    idx = jnp.min(jnp.where(d <= dmin, iota_k, Kp), axis=-1, keepdims=True)  # first-min index
    onehot = (iota_k == idx).astype(E.dtype)                            # (TL+2, Kp)
    zq_h = jnp.dot(onehot, E, preferred_element_type=jnp.float32)       # (TL+2, Dp) f32

    # zero the halo rows that fall outside [0, L): they represent the decoder's zero padding
    row = jax.lax.broadcasted_iota(jnp.int32, (zq_h.shape[0], 1), 0)
    keep = jnp.logical_and(jnp.logical_or(li > 0, row > 0),
                           jnp.logical_or(li < nl - 1, row < TL + 1))
    zq_h = jnp.where(keep, zq_h, 0.0)

    zq_scr[...] = zq_h                                                  # (TL+2, Dp) scratch
    z_ref[0] = z_h[1:-1]                                                # central TL rows
    zq_ref[0] = zq_scr[pl.ds(1, TL), :]

    # ---- decoder: Conv1d(D -> Cout, k=3, same pad) fused into one matmul over 3 ref-slices ----
    zq_cat = jnp.concatenate(
        [zq_scr[pl.ds(0, TL), :], zq_scr[pl.ds(1, TL), :], zq_scr[pl.ds(2, TL), :]],
        axis=-1).astype(E.dtype)                                        # (TL, 3*Dp)
    recon = (jnp.dot(zq_cat, wdec_ref[...], preferred_element_type=jnp.float32)
             + bdec_ref[...])                                           # (TL, Coutp)
    recon_ref[0] = recon


def vqvae_forward(x_ncl, params, *, tl_max=256, matmul_dtype=jnp.float32):
    """x_ncl: (B, Cin, L) float32 (PyTorch NCL). Returns (recon_x, z_q, z), all NCL."""
    W_enc, b_enc, codebook, W_dec, b_dec = params
    B, Cin, L = x_ncl.shape
    K, D = codebook.shape
    Cout = W_dec.shape[2]

    Dp = _round_up(D, LANE)
    Kp = _round_up(K, LANE)
    Cop = _round_up(Cout, LANE)
    C3p = _round_up(3 * Cin, LANE)

    TL = _pick_tile(L, tl_max)
    nL = L // TL

    x = jnp.transpose(x_ncl, (0, 2, 1)).astype(jnp.float32)             # (B, L, Cin)

    # wrapper-side im2col (k=3, 'same'): row l = [x(l-1), x(l), x(l+1)]
    xp = jnp.pad(x, ((0, 0), (1, 1), (0, 0)))
    x_cat = jnp.concatenate([xp[:, :-2], xp[:, 1:-1], xp[:, 2:]], axis=-1)   # (B, L, 3Cin)
    # halo rows for positions -1 and L (values unused; their z_q is zeroed in-kernel)
    x_cat = jnp.pad(x_cat, ((0, 0), (1, 1), (0, C3p - 3 * Cin)))             # (B, L+2, C3p)
    # overlapping windows of TL+2 rows with stride TL
    win_idx = jnp.arange(nL)[:, None] * TL + jnp.arange(TL + 2)[None, :]
    x_win = jnp.take(x_cat, win_idx, axis=1).astype(matmul_dtype)            # (B, nL, TL+2, C3p)

    # fused + lane-padded parameters
    W_enc_f = jnp.pad(W_enc.reshape(3 * Cin, D),
                      ((0, C3p - 3 * Cin), (0, Dp - D))).astype(matmul_dtype)      # (C3p, Dp)
    b_enc_p = jnp.pad(b_enc.reshape(1, -1), ((0, 0), (0, Dp - D))).astype(jnp.float32)
    E_p = jnp.pad(codebook, ((0, Kp - K), (0, Dp - D))).astype(matmul_dtype)        # (Kp, Dp)
    e_sq = jnp.sum(codebook.astype(jnp.float32) ** 2, axis=-1)[None, :]             # (1, K)
    e_sq_p = jnp.pad(e_sq, ((0, 0), (0, Kp - K)), constant_values=1e30)             # pad rows never win
    W_dec_f = jnp.pad(W_dec, ((0, 0), (0, Dp - D), (0, Cop - Cout))
                      ).reshape(3 * Dp, Cop).astype(matmul_dtype)                   # (3*Dp, Coutp)
    b_dec_p = jnp.pad(b_dec.reshape(1, -1), ((0, 0), (0, Cop - Cout))).astype(jnp.float32)

    out_shapes = (
        jax.ShapeDtypeStruct((B, L, Cop), jnp.float32),   # recon (lane-padded)
        jax.ShapeDtypeStruct((B, L, Dp), jnp.float32),    # z_q   (lane-padded)
        jax.ShapeDtypeStruct((B, L, Dp), jnp.float32),    # z     (lane-padded)
    )

    recon, zq, z = pl.pallas_call(
        vqvae_kernel,
        out_shape=out_shapes,
        grid_spec=pltpu.PrefetchScalarGridSpec(
            num_scalar_prefetch=0,
            grid=(B, nL),
            in_specs=[
                pl.BlockSpec((1, 1, TL + 2, C3p), lambda b, l: (b, l, 0, 0)),
                pl.BlockSpec((C3p, Dp), lambda b, l: (0, 0)),
                pl.BlockSpec((1, Dp), lambda b, l: (0, 0)),
                pl.BlockSpec((Kp, Dp), lambda b, l: (0, 0)),
                pl.BlockSpec((1, Kp), lambda b, l: (0, 0)),
                pl.BlockSpec((3 * Dp, Cop), lambda b, l: (0, 0)),
                pl.BlockSpec((1, Cop), lambda b, l: (0, 0)),
            ],
            out_specs=[
                pl.BlockSpec((1, TL, Cop), lambda b, l: (b, l, 0)),
                pl.BlockSpec((1, TL, Dp), lambda b, l: (b, l, 0)),
                pl.BlockSpec((1, TL, Dp), lambda b, l: (b, l, 0)),
            ],
            scratch_shapes=[pltpu.VMEM((TL + 2, Dp), jnp.float32)],
        ),
        compiler_params=pltpu.CompilerParams(
            dimension_semantics=("parallel", "parallel"),
            vmem_limit_bytes=64 * 1024 * 1024,
        ),
    )(x_win, W_enc_f, b_enc_p, E_p, e_sq_p, W_dec_f, b_dec_p)

    # slice off lane padding, back to PyTorch NCL convention
    # (z is kept as an output because the module's forward returns it.)
    return (jnp.transpose(recon[:, :, :Cout], (0, 2, 1)),
            jnp.transpose(zq[:, :, :D], (0, 2, 1)),
            jnp.transpose(z[:, :, :D], (0, 2, 1)))


def reference_forward(x_ncl, params):
    """Pure-JAX reference with identical semantics (for correctness check)."""
    W_enc, b_enc, E, W_dec, b_dec = params
    x = jnp.transpose(x_ncl, (0, 2, 1))                    # (B, L, Cin)

    def conv3(h, W, b):                                    # same-padded k=3 conv, channel-last
        p = jnp.pad(h, ((0, 0), (1, 1), (0, 0)))
        return p[:, :-2] @ W[0] + p[:, 1:-1] @ W[1] + p[:, 2:] @ W[2] + b

    z = conv3(x, W_enc, b_enc)                             # (B, L, D)
    d = (jnp.sum(z * z, -1, keepdims=True)
         - 2.0 * jnp.einsum('bld,kd->blk', z, E)
         + jnp.sum(E * E, -1))
    idx = jnp.argmin(d, axis=-1)
    zq = E[idx]                                            # (B, L, D)
    recon = conv3(zq, W_dec, b_dec)                        # (B, L, Cout)
    return (jnp.transpose(recon, (0, 2, 1)),
            jnp.transpose(zq, (0, 2, 1)),
            jnp.transpose(z, (0, 2, 1)))


if __name__ == "__main__":
    # Small, module-consistent shapes: x is (B, Cin, L); VQ permutes channels last.
    B, Cin, L = 2, 8, 16
    D, K, Cout = 16, 32, 8

    key = jax.random.PRNGKey(0)
    kx, kwe, kbe, kcb, kwd, kbd = jax.random.split(key, 6)

    x = jax.random.normal(kx, (B, Cin, L), dtype=jnp.float32)

    # Deterministic synthetic parameters (conv weights stored as (k_tap, in_ch, out_ch)).
    W_enc = 0.3 * jax.random.normal(kwe, (3, Cin, D), dtype=jnp.float32)
    b_enc = 0.1 * jax.random.normal(kbe, (1, D), dtype=jnp.float32)
    codebook = jax.random.normal(kcb, (K, D), dtype=jnp.float32)
    W_dec = 0.3 * jax.random.normal(kwd, (3, D, Cout), dtype=jnp.float32)
    b_dec = 0.1 * jax.random.normal(kbd, (1, Cout), dtype=jnp.float32)
    params = (W_enc, b_enc, codebook, W_dec, b_dec)

    # f32 matmuls in the demo so distances/argmin (and hence z_q) match the reference exactly;
    # pass matmul_dtype=jnp.bfloat16 on v6e/v7x for full-rate MXU (accumulation stays f32).
    recon, zq, z = jax.block_until_ready(vqvae_forward(x, params))
    recon_r, zq_r, z_r = jax.block_until_ready(reference_forward(x, params))

    assert recon.shape == (B, Cout, L) and zq.shape == (B, D, L) and z.shape == (B, D, L)
    assert jnp.allclose(z, z_r, atol=1e-4, rtol=1e-4)
    assert jnp.allclose(zq, zq_r, atol=1e-4, rtol=1e-4)
    assert jnp.allclose(recon, recon_r, atol=1e-4, rtol=1e-4)

    print("KERNEL_OK")
</pallas_src>

<mosaic_0001>
module attributes {stable_mosaic.version = 11 : i64} {
  func.func @vqvae_kernel(%arg0: i32, %arg1: i32, %arg2: memref<1x1x18x128xf32, #tpu.memory_space<vmem>>, %arg3: memref<128x128xf32, #tpu.memory_space<vmem>>, %arg4: memref<1x128xf32, #tpu.memory_space<vmem>>, %arg5: memref<128x128xf32, #tpu.memory_space<vmem>>, %arg6: memref<1x128xf32, #tpu.memory_space<vmem>>, %arg7: memref<384x128xf32, #tpu.memory_space<vmem>>, %arg8: memref<1x128xf32, #tpu.memory_space<vmem>>, %arg9: memref<1x16x128xf32, #tpu.memory_space<vmem>>, %arg10: memref<1x16x128xf32, #tpu.memory_space<vmem>>, %arg11: memref<1x16x128xf32, #tpu.memory_space<vmem>>, %arg12: memref<18x128xf32, #tpu.memory_space<vmem>>) attributes {dimension_semantics = [#tpu.dimension_semantics<parallel>, #tpu.dimension_semantics<parallel>], iteration_bounds = array<i64: 2, 1>, scalar_prefetch = 0 : i64, scratch_operands = 1 : i64, tpu.core_type = #tpu.core_type<tc>, window_params = [{transform_indices = @transform_0, window_bounds = array<i64: 1, 1, 18, 128>}, {pipeline_mode = #tpu.pipeline_mode<synchronous>, transform_indices = @transform_1, window_bounds = array<i64: 128, 128>}, {pipeline_mode = #tpu.pipeline_mode<synchronous>, transform_indices = @transform_2, window_bounds = array<i64: 1, 128>}, {pipeline_mode = #tpu.pipeline_mode<synchronous>, transform_indices = @transform_3, window_bounds = array<i64: 128, 128>}, {pipeline_mode = #tpu.pipeline_mode<synchronous>, transform_indices = @transform_4, window_bounds = array<i64: 1, 128>}, {pipeline_mode = #tpu.pipeline_mode<synchronous>, transform_indices = @transform_5, window_bounds = array<i64: 384, 128>}, {pipeline_mode = #tpu.pipeline_mode<synchronous>, transform_indices = @transform_6, window_bounds = array<i64: 1, 128>}, {transform_indices = @transform_7, window_bounds = array<i64: 1, 16, 128>}, {transform_indices = @transform_8, window_bounds = array<i64: 1, 16, 128>}, {transform_indices = @transform_9, window_bounds = array<i64: 1, 16, 128>}]} {
    %c0 = arith.constant 0 : index
    %c0_0 = arith.constant 0 : index
    %c0_1 = arith.constant 0 : index
    %c0_2 = arith.constant 0 : index
    %0 = vector.load %arg2[%c0, %c0_0, %c0_1, %c0_2] : memref<1x1x18x128xf32, #tpu.memory_space<vmem>>, vector<1x1x18x128xf32>
    %1 = vector.shape_cast %0 : vector<1x1x18x128xf32> to vector<18x128xf32>
    %c0_3 = arith.constant 0 : index
    %c0_4 = arith.constant 0 : index
    %2 = vector.load %arg5[%c0_3, %c0_4] : memref<128x128xf32, #tpu.memory_space<vmem>>, vector<128x128xf32>
    %c0_5 = arith.constant 0 : index
    %c0_6 = arith.constant 0 : index
    %3 = vector.load %arg3[%c0_5, %c0_6] : memref<128x128xf32, #tpu.memory_space<vmem>>, vector<128x128xf32>
    %cst = arith.constant dense<0.000000e+00> : vector<18x128xf32>
    %4 = tpu.matmul %1, %3, %cst {dimension_numbers = #tpu.dot_dimension_numbers<[1], [0], [0], [1], [0, 0, 1, 1], [], []>} : vector<18x128xf32>, vector<128x128xf32>, vector<18x128xf32> -> vector<18x128xf32>
    %c0_7 = arith.constant 0 : index
    %c0_8 = arith.constant 0 : index
    %5 = vector.load %arg4[%c0_7, %c0_8] : memref<1x128xf32, #tpu.memory_space<vmem>>, vector<1x128xf32>
    %6 = vector.broadcast %5 : vector<1x128xf32> to vector<18x128xf32>
    %7 = arith.addf %4, %6 : vector<18x128xf32>
    %8 = arith.mulf %7, %7 : vector<18x128xf32>
    %cst_9 = arith.constant dense<0.000000e+00> : vector<18xf32>
    %9 = vector.multi_reduction <add>, %8, %cst_9 [1] : vector<18x128xf32> to vector<18xf32>
    %10 = vector.shape_cast %9 : vector<18xf32> to vector<18x1xf32>
    %cst_10 = arith.constant dense<0.000000e+00> : vector<18x128xf32>
    %11 = tpu.matmul %7, %2, %cst_10 {dimension_numbers = #tpu.dot_dimension_numbers<[1], [1], [0], [0], [0, 0, 1, 0], [], []>} : vector<18x128xf32>, vector<128x128xf32>, vector<18x128xf32> -> vector<18x128xf32>
    %cst_11 = arith.constant 2.000000e+00 : f32
    %12 = vector.broadcast %cst_11 : f32 to vector<18x128xf32>
    %13 = arith.mulf %12, %11 : vector<18x128xf32>
    %14 = vector.broadcast %10 : vector<18x1xf32> to vector<18x128xf32>
    %15 = arith.subf %14, %13 : vector<18x128xf32>
    %c0_12 = arith.constant 0 : index
    %c0_13 = arith.constant 0 : index
    %16 = vector.load %arg6[%c0_12, %c0_13] : memref<1x128xf32, #tpu.memory_space<vmem>>, vector<1x128xf32>
    %17 = vector.broadcast %16 : vector<1x128xf32> to vector<18x128xf32>
    %18 = arith.addf %15, %17 : vector<18x128xf32>
    %19 = tpu.iota {dimensions = array<i32: 1>} : vector<18x128xi32>
    %cst_14 = arith.constant dense<0x7F800000> : vector<18xf32>
    %20 = vector.multi_reduction <minimumf>, %18, %cst_14 [1] : vector<18x128xf32> to vector<18xf32>
    %21 = vector.shape_cast %20 : vector<18xf32> to vector<18x1xf32>
    %22 = vector.broadcast %21 : vector<18x1xf32> to vector<18x128xf32>
    %23 = arith.cmpf ole, %18, %22 : vector<18x128xf32>
    %c128_i32 = arith.constant 128 : i32
    %24 = vector.broadcast %c128_i32 : i32 to vector<18x128xi32>
    %25 = arith.select %23, %19, %24 : vector<18x128xi1>, vector<18x128xi32>
    %cst_15 = arith.constant dense<2147483647> : vector<18xi32>
    %26 = vector.multi_reduction <minsi>, %25, %cst_15 [1] : vector<18x128xi32> to vector<18xi32>
    %27 = vector.shape_cast %26 : vector<18xi32> to vector<18x1xi32>
    %28 = vector.broadcast %27 : vector<18x1xi32> to vector<18x128xi32>
    %29 = arith.cmpi eq, %19, %28 : vector<18x128xi32>
    %30 = arith.extui %29 : vector<18x128xi1> to vector<18x128xi32>
    %31 = arith.sitofp %30 : vector<18x128xi32> to vector<18x128xf32>
    %cst_16 = arith.constant dense<0.000000e+00> : vector<18x128xf32>
    %32 = tpu.matmul %31, %2, %cst_16 {dimension_numbers = #tpu.dot_dimension_numbers<[1], [0], [0], [1], [0, 0, 1, 1], [], []>} : vector<18x128xf32>, vector<128x128xf32>, vector<18x128xf32> -> vector<18x128xf32>
    %33 = tpu.iota {dimensions = array<i32: 0>} : vector<18x1xi32>
    %c0_i32 = arith.constant 0 : i32
    %34 = arith.cmpi sgt, %arg1, %c0_i32 : i32
    %c0_i32_17 = arith.constant 0 : i32
    %35 = vector.broadcast %c0_i32_17 : i32 to vector<18x1xi32>
    %36 = arith.cmpi sgt, %33, %35 : vector<18x1xi32>
    %37 = vector.broadcast %34 : i1 to vector<18x1xi1>
    %38 = arith.ori %37, %36 : vector<18x1xi1>
    %c0_i32_18 = arith.constant 0 : i32
    %39 = arith.cmpi slt, %arg1, %c0_i32_18 : i32
    %c17_i32 = arith.constant 17 : i32
    %40 = vector.broadcast %c17_i32 : i32 to vector<18x1xi32>
    %41 = arith.cmpi slt, %33, %40 : vector<18x1xi32>
    %42 = vector.broadcast %39 : i1 to vector<18x1xi1>
    %43 = arith.ori %42, %41 : vector<18x1xi1>
    %44 = arith.andi %38, %43 : vector<18x1xi1>
    %cst_19 = arith.constant 0.000000e+00 : f32
    %45 = vector.shape_cast %44 : vector<18x1xi1> to vector<18x1xi1>
    %46 = vector.broadcast %45 : vector<18x1xi1> to vector<18x128xi1>
    %47 = vector.broadcast %cst_19 : f32 to vector<18x128xf32>
    %48 = arith.select %46, %32, %47 : vector<18x128xi1>, vector<18x128xf32>
    %c0_20 = arith.constant 0 : index
    %c0_21 = arith.constant 0 : index
    %49 = vector.load %arg12[%c0_20, %c0_21] : memref<18x128xf32, #tpu.memory_space<vmem>>, vector<18x128xf32>
    tpu.vector_store %arg12[%c0_20, %c0_21], %48 {strides = array<i32>} : memref<18x128xf32, #tpu.memory_space<vmem>>, vector<18x128xf32>,
    %50 = vector.extract_strided_slice %7 {offsets = [1, 0], sizes = [16, 128], strides = [1, 1]} : vector<18x128xf32> to vector<16x128xf32>
    %c0_22 = arith.constant 0 : index
    %c0_23 = arith.constant 0 : index
    %c0_24 = arith.constant 0 : index
    %51 = vector.load %arg11[%c0_22, %c0_23, %c0_24] : memref<1x16x128xf32, #tpu.memory_space<vmem>>, vector<1x16x128xf32>
    %52 = vector.shape_cast %51 : vector<1x16x128xf32> to vector<16x128xf32>
    %53 = vector.shape_cast %50 : vector<16x128xf32> to vector<1x16x128xf32>
    tpu.vector_store %arg11[%c0_22, %c0_23, %c0_24], %53 {strides = array<i32>} : memref<1x16x128xf32, #tpu.memory_space<vmem>>, vector<1x16x128xf32>,
    %c1 = arith.constant 1 : index
    %c0_25 = arith.constant 0 : index
    %54 = vector.load %arg12[%c1, %c0_25] : memref<18x128xf32, #tpu.memory_space<vmem>>, vector<16x128xf32>
    %c0_26 = arith.constant 0 : index
    %c0_27 = arith.constant 0 : index
    %c0_28 = arith.constant 0 : index
    %55 = vector.load %arg10[%c0_26, %c0_27, %c0_28] : memref<1x16x128xf32, #tpu.memory_space<vmem>>, vector<1x16x128xf32>
    %56 = vector.shape_cast %55 : vector<1x16x128xf32> to vector<16x128xf32>
    %57 = vector.shape_cast %54 : vector<16x128xf32> to vector<1x16x128xf32>
    tpu.vector_store %arg10[%c0_26, %c0_27, %c0_28], %57 {strides = array<i32>} : memref<1x16x128xf32, #tpu.memory_space<vmem>>, vector<1x16x128xf32>,
    %c0_29 = arith.constant 0 : index
    %c0_30 = arith.constant 0 : index
    %58 = vector.load %arg12[%c0_29, %c0_30] : memref<18x128xf32, #tpu.memory_space<vmem>>, vector<16x128xf32>
    %c1_31 = arith.constant 1 : index
    %c0_32 = arith.constant 0 : index
    %59 = vector.load %arg12[%c1_31, %c0_32] : memref<18x128xf32, #tpu.memory_space<vmem>>, vector<16x128xf32>
    %c2 = arith.constant 2 : index
    %c0_33 = arith.constant 0 : index
    %60 = vector.load %arg12[%c2, %c0_33] : memref<18x128xf32, #tpu.memory_space<vmem>>, vector<16x128xf32>
    %61 = tpu.concatenate %58, %59, %60 in 1 : vector<16x128xf32>, vector<16x128xf32>, vector<16x128xf32> -> vector<16x384xf32>
    %c0_34 = arith.constant 0 : index
    %c0_35 = arith.constant 0 : index
    %62 = vector.load %arg7[%c0_34, %c0_35] : memref<384x128xf32, #tpu.memory_space<vmem>>, vector<384x128xf32>
    %cst_36 = arith.constant dense<0.000000e+00> : vector<16x128xf32>
    %63 = tpu.matmul %61, %62, %cst_36 {dimension_numbers = #tpu.dot_dimension_numbers<[1], [0], [0], [1], [0, 0, 1, 1], [], []>} : vector<16x384xf32>, vector<384x128xf32>, vector<16x128xf32> -> vector<16x128xf32>
    %c0_37 = arith.constant 0 : index
    %c0_38 = arith.constant 0 : index
    %64 = vector.load %arg8[%c0_37, %c0_38] : memref<1x128xf32, #tpu.memory_space<vmem>>, vector<1x128xf32>
    %65 = vector.broadcast %64 : vector<1x128xf32> to vector<16x128xf32>
    %66 = arith.addf %63, %65 : vector<16x128xf32>
    %c0_39 = arith.constant 0 : index
    %c0_40 = arith.constant 0 : index
    %c0_41 = arith.constant 0 : index
    %67 = vector.load %arg9[%c0_39, %c0_40, %c0_41] : memref<1x16x128xf32, #tpu.memory_space<vmem>>, vector<1x16x128xf32>
    %68 = vector.shape_cast %67 : vector<1x16x128xf32> to vector<16x128xf32>
    %69 = vector.shape_cast %66 : vector<16x128xf32> to vector<1x16x128xf32>
    tpu.vector_store %arg9[%c0_39, %c0_40, %c0_41], %69 {strides = array<i32>} : memref<1x16x128xf32, #tpu.memory_space<vmem>>, vector<1x16x128xf32>,
    return
  }
  func.func @transform_0(%arg0: i32, %arg1: i32) -> (i32, i32, i32, i32) {
    %c0_i32 = arith.constant 0 : i32
    %c0_i32_0 = arith.constant 0 : i32
    %c0_i32_1 = arith.constant 0 : i32
    return %arg0, %arg1, %c0_i32, %c0_i32_0 : i32, i32, i32, i32
  }
  func.func @transform_1(%arg0: i32, %arg1: i32) -> (i32, i32) {
    %c0_i32 = arith.constant 0 : i32
    %c0_i32_0 = arith.constant 0 : i32
    %c0_i32_1 = arith.constant 0 : i32
    return %c0_i32, %c0_i32_0 : i32, i32
  }
  func.func @transform_2(%arg0: i32, %arg1: i32) -> (i32, i32) {
    %c0_i32 = arith.constant 0 : i32
    %c0_i32_0 = arith.constant 0 : i32
    %c0_i32_1 = arith.constant 0 : i32
    return %c0_i32, %c0_i32_0 : i32, i32
  }
  func.func @transform_3(%arg0: i32, %arg1: i32) -> (i32, i32) {
    %c0_i32 = arith.constant 0 : i32
    %c0_i32_0 = arith.constant 0 : i32
    %c0_i32_1 = arith.constant 0 : i32
    return %c0_i32, %c0_i32_0 : i32, i32
  }
  func.func @transform_4(%arg0: i32, %arg1: i32) -> (i32, i32) {
    %c0_i32 = arith.constant 0 : i32
    %c0_i32_0 = arith.constant 0 : i32
    %c0_i32_1 = arith.constant 0 : i32
    return %c0_i32, %c0_i32_0 : i32, i32
  }
  func.func @transform_5(%arg0: i32, %arg1: i32) -> (i32, i32) {
    %c0_i32 = arith.constant 0 : i32
    %c0_i32_0 = arith.constant 0 : i32
    %c0_i32_1 = arith.constant 0 : i32
    return %c0_i32, %c0_i32_0 : i32, i32
  }
  func.func @transform_6(%arg0: i32, %arg1: i32) -> (i32, i32) {
    %c0_i32 = arith.constant 0 : i32
    %c0_i32_0 = arith.constant 0 : i32
    %c0_i32_1 = arith.constant 0 : i32
    return %c0_i32, %c0_i32_0 : i32, i32
  }
  func.func @transform_7(%arg0: i32, %arg1: i32) -> (i32, i32, i32) {
    %c0_i32 = arith.constant 0 : i32
    %c0_i32_0 = arith.constant 0 : i32
    return %arg0, %arg1, %c0_i32 : i32, i32, i32
  }
  func.func @transform_8(%arg0: i32, %arg1: i32) -> (i32, i32, i32) {
    %c0_i32 = arith.constant 0 : i32
    %c0_i32_0 = arith.constant 0 : i32
    return %arg0, %arg1, %c0_i32 : i32, i32, i32
  }
  func.func @transform_9(%arg0: i32, %arg1: i32) -> (i32, i32, i32) {
    %c0_i32 = arith.constant 0 : i32
    %c0_i32_0 = arith.constant 0 : i32
    return %arg0, %arg1, %c0_i32 : i32, i32, i32
  }
}

</mosaic_0001>

<bundles_post_ra>
// kernel: tpu_custom_call.1
= control target key start
LH: loop header
LB: loop body
LE: loop exit
PB: predicated region body
PF: predicated region fallthrough
CT: control target
= control target key end

     0   :  { %s1744_s0 = inlined_call_operand.vmem [shape: f32[2,1,18,128], index: 0, kind: input, shape index: {}]   ;;  %s1745_s1 = inlined_call_operand.hbm [shape: f32[128,128], index: 1, kind: input, shape index: {}]   ;;  %s1746_s2 = inlined_call_operand.vmem [shape: f32[1,128], index: 2, kind: input, shape index: {}]   ;;  %s1747_s3 = inlined_call_operand.hbm [shape: f32[128,128], index: 3, kind: input, shape index: {}]   ;;  %s1748_s4 = inlined_call_operand.vmem [shape: f32[1,128], index: 4, kind: input, shape index: {}]   ;;  %s1749_s5 = inlined_call_operand.hbm [shape: f32[384,128], index: 5, kind: input, shape index: {}]   ;;  %s1750_s6 = inlined_call_operand.vmem [shape: f32[1,128], index: 6, kind: input, shape index: {}]   ;;  %s1751_s7 = inlined_call_operand.hbm [shape: f32[2,16,128], index: 7, kind: output, shape index: {0}]   ;;  %s1752_s8 = inlined_call_operand.hbm [shape: f32[2,16,128], index: 8, kind: output, shape index: {1}]   ;;  %s1753_s9 = inlined_call_operand.hbm [shape: f32[2,16,128], index: 9, kind: output, shape index: {2}]  }
   0x1   :  { %1760 = sst [smem:[#allocation22_spill]] %s1747_s3 }
   0x2   :  { %15 = vsyncpa [#allocation4], 0 }
   0x3   :  { %16 = vsyncpa [#allocation7], 0 }
   0x4   :  { %17 = vsyncpa [#allocation5], 0 }
   0x5   :  { %19 = vsyncpa [#allocation5 + $0x1], 0 }
   0x6   :  { %20 = vsyncpa [#allocation11], 0 }
   0x7   :  { %22 = vsyncpa [#allocation11 + $0x1], 0  ;;  %s1502_s30 = smov 0   ;;  %s1504_s10 = smov 0  }
   0x8   :  { %s1506_s11 = smov 0   ;;  %s1508_s12 = smov 0  }
   0x9   :  { %s1510_s13 = smov 0   ;;  %s1512_s14 = smov 0  }
   0xa LB: > { %1761 = sst [smem:[#allocation17_spill]] %s1430_s11  ;;  %s1533_s15 = sadd.s32 4294967295, %s1442_s14   ;;  %s1442_s14 = sphi %s1512_s14, %s28_s14   ;;  %s1438_s13 = sphi %s1510_s13, %s1781_s13   ;;  %s1434_s12 = sphi %s1508_s12, %s1777_s12   ;;  %s1430_s11 = sphi %s1506_s11, %s1776_s11   ;;  %s1426_s10 = sphi %s1504_s10, %s1780_s10   ;;  %s1422_s30 = sphi %s1502_s30, %s1779_s30  }
   0xb   : > { %1762 = sst [smem:[#allocation18_spill]] %s1438_s13  ;;  %s1754_s16 = sadd.s32 4294967294, %s1442_s14  }
   0xc   : > { %s40_s17 = sadd.s32 1, %s1438_s13  ;;  %s203_s18 = sadd.s32 1, %s1430_s11 }
   0xd   : > { %p42_p0 = scmp.ge.s32.totalorder %s40_s17, 2  ;;  %p213_p1 = scmp.ne.s32.totalorder %s1430_s11, %s1426_s10 }
   0xe   : > { %p214_p2 = scmp.eq.s32.totalorder %s1533_s15, 1  ;;  %p219_p3 = scmp.ne.s32.totalorder %s1426_s10, %s1422_s30 }
   0xf   : > { %s1783_s17 = smov (%p42_p0, %s40_s17), 0  ;;  %p220_p5 = scmp.eq.s32.totalorder %s1754_s16, 1 }
  0x10   : > { %1763 = sst [smem:[#allocation19_spill]] %s1783_s17  ;;  %p1545_p4 = por %p214_p2, %p213_p1 }
  0x11   : > { %s198_s20 = ssub.s32 %s1438_s13, %s1783_s17  ;;  %p1067_p6 = scmp.ge.s32.totalorder %s1442_s14, 1 }
  0x12   : > { %p201_p7 = scmp.eq.s32.totalorder %s198_s20, 0  ;;  %p1554_p8 = por %p220_p5, %p219_p3 }
  0x13   : > { %p283_p9 = scmp.lt.s32.totalorder %s1442_s14, 3  ;;  %p1139_p11 = scmp.eq.s32.totalorder %s1533_s15, 0 }
  0x14   : > { %s1765_s21 = scalar_select %p1554_p8, 1, 0 }
  0x15   : > { %s1560_s22 = scalar_select %p201_p7, %s1430_s11, %s203_s18  }
  0x16   : > { %1766 = sst [smem:[#allocation20_spill]] %s1765_s21  ;;  %p1562_p10 = pnand %p1067_p6, %p283_p9 }
  0x17   : > { %1767 = sst [smem:[#allocation21_spill]] %s1560_s22  ;;  %s1444_s28 = smov [#allocation6]  }
  0x18   : > { %p1119_p12 = pneg %p1562_p10  ;;  %s1769_s3 = sld [smem:[#allocation22_spill]] }
  0x19   : > { %s313_s29 = sshll.u32 %s1444_s28, 4  ;;  %s1445_s18 = smov 128   ;;  %s314_s29 = int_to_ptr.vmem [resolvable:$true] %s313_s29 }
  0x1a   : > { %p1574_p13 = pnand %p1139_p11, %p1119_p12  ;;  %s1446_s20 = smov 8  }
  0x1b   : > { %s294_s24 = sshll.u32 %s1745_s1, 4  ;;  %s1447_s25 = smov [#allocation3]   ;;  %s295_s24 = int_to_ptr.hbm [resolvable:$true] %s294_s24 }
  0x1c   : > { %s328_s11 = sshll.u32 %s1749_s5, 4  ;;  %s1448_s28 = smov [#allocation8]   ;;  %s329_s11 = int_to_ptr.hbm [resolvable:$true] %s328_s11 }
  0x1d   : > { %s330_s21 = sshll.u32 %s1448_s28, 4  ;;  %361 = sbr.rel (%p1562_p10) target bundleno = 987 (0x3db), region = 48  ;;  %s331_s21 = int_to_ptr.vmem [resolvable:$true] %s330_s21 }
  0x1e   : > { %s311_s26 = sshll.u32 %s1769_s3, 4  ;;  %s296_s3 = sshll.u32 %s1447_s25, 4  ;;  %s312_s26 = int_to_ptr.hbm [resolvable:$true] %s311_s26  ;;  %s297_s3 = int_to_ptr.vmem [resolvable:$true] %s296_s3 }
  0x1f   : > { %1125 = dma.hbm_to_vmem [thread:$0]  (!%p1574_p13), %s312_s26, 2048, %s314_s29, [#allocation7], %s1445_s18, %s1445_s18, %s1446_s20  }
  0x20   : > { %1122 = dma.hbm_to_vmem [thread:$0]  (!%p1574_p13), %s295_s24, 2048, %s297_s3, [#allocation4], %s1445_s18, %s1445_s18, %s1446_s20  }
  0x21   : > { %1128 = dma.hbm_to_vmem [thread:$0]  (!%p1574_p13), %s329_s11, 6144, %s331_s21, [#allocation7], %s1445_s18, %s1445_s18, %s1446_s20  }
  0x22   : > { %1405 = dma.done.wait (%p1139_p11), [#allocation4], 2048  }
  0x23   : > { %1407 = vsyncadd (%p1139_p11), [#allocation4], 4294965248 }
  0x24   : > { %1409 = dma.done.wait (%p1139_p11), [#allocation7], 8192  }
  0x25   : > { %1411 = vsyncadd (%p1139_p11), [#allocation7], 4294959104  ;;  %v468_v0 = vld [vmem:[#allocation3 + $0x78] sm:$0xff]  ;;  %v467_v1 = vld [vmem:[#allocation3 + $0x70] sm:$0xff]  ;;  %p422_p0 = scmp.lt.s32.totalorder %s1434_s12, 1  ;;  %s1759_s21 = sand.u32 1, %s1426_s10   ;;  %v549_v63 = vlaneseq }
  0x26   : > { %473 = vmatpush.msra.mxu0 %v468_v0  ;;  %v466_v2 = vld [vmem:[#allocation3 + $0x68] sm:$0xff]  ;;  %v465_v3 = vld [vmem:[#allocation3 + $0x60] sm:$0xff]  ;;  %v464_v4 = vld [vmem:[#allocation3 + $0x58] sm:$0xff]  ;;  %s1613_s22 = sshll.u32 %s1759_s21, 4  ;;  %vm506_vm0 = vcmask 1041408   ;;  %s1650_s24 = sshll.u32 %s1434_s12, 4 }
  0x27   : > { %v463_v5 = vld [vmem:[#allocation3 + $0x50] sm:$0xff]  ;;  %v462_v6 = vld [vmem:[#allocation3 + $0x48] sm:$0xff]  ;;  %v461_v7 = vld [vmem:[#allocation3 + $0x40] sm:$0xff]  ;;  %s423_s3 = scalar_select %p422_p0, %s1434_s12, 1  ;;  %v1630_v0 = vand.u32 127, %v549_v63 }
  0x28   : > { %474 = vmatpush.msra.mxu0 %v467_v1  ;;  %v460_v8 = vld [vmem:[#allocation3 + $0x38] sm:$0xff]  ;;  %v459_v9 = vld [vmem:[#allocation3 + $0x30] sm:$0xff]  ;;  %v458_v11 = vld [vmem:[#allocation3 + $0x28] sm:$0xff]  ;;  %s1619_s27 = scalar_lea.vmem [#allocation12], %s1613_s22  ;;  %s414_s20 = scalar_lea.vmem [#allocation10], %s1613_s22 }
  0x29   : > { %v452_v10 = vld [vmem:[#allocation6 + $0x78] sm:$0xff]  ;;  %v451_v12 = vld [vmem:[#allocation6 + $0x70] sm:$0xff]  ;;  %v457_v13 = vld [vmem:[#allocation3 + $0x20] sm:$0xff]  ;;  %s1100_s11 = smul.u32 24, %s423_s3  ;;  %s822_s13 = sand.u32 1, %s1533_s15  }
  0x2a   : > { %475 = vmatpush.msra.mxu0 %v466_v2  ;;  %510 = vmatpush.xpose.msra.mxu1 %v452_v10  ;;  %v450_v14 = vld [vmem:[#allocation6 + $0x68] sm:$0xff]  ;;  %v456_v15 = vld [vmem:[#allocation3 + $0x18] sm:$0xff]  ;;  %v449_v16 = vld [vmem:[#allocation6 + $0x60] sm:$0xff]  ;;  %s861_s16 = sshll.u32 %s414_s20, 4  ;;  %s879_s29 = scalar_lea.hbm %s1753_s9, %s1650_s24  ;;  %s862_s16 = int_to_ptr.vmem [resolvable:$true] %s861_s16 }
  0x2b   : > { %616 = vmatpush.msra.mxu2 %v452_v10  ;;  %v455_v17 = vld [vmem:[#allocation3 + $0x10] sm:$0xff]  ;;  %v448_v18 = vld [vmem:[#allocation6 + $0x58] sm:$0xff]  ;;  %v454_v19 = vld [vmem:[#allocation3 + $0x8] sm:$0xff]  ;;  %s1605_s17 = scalar_lea.vmem %s1744_s0, %s1100_s11  ;;  %s860_s11 = scalar_lea.hbm %s1752_s8, %s1650_s24 }
  0x2c   : > { %476 = vmatpush.msra.mxu0 %v465_v3  ;;  %v447_v20 = vld [vmem:[#allocation6 + $0x50] sm:$0xff]  ;;  %v453_v21 = vld [vmem:[#allocation3] sm:$0xff]  ;;  %v434_v22 = vld [vmem:[%s1605_s17] sm:$0xff]  ;;  %s1662_s18 = sshll.u32 %s879_s29, 4  ;;  %s1664_s12 = scalar_lea.sflag [#allocation11], %s822_s13  ;;  %s883_s18 = int_to_ptr.hbm [resolvable:$true] %s1662_s18 }
  0x2d   : > { %617 = vmatpush.msra.mxu2 %v451_v12  ;;  %v446_v23 = vld [vmem:[#allocation6 + $0x48] sm:$0xff]  ;;  %v445_v24 = vld [vmem:[#allocation6 + $0x40] sm:$0xff]  ;;  %v444_v25 = vld [vmem:[#allocation6 + $0x38] sm:$0xff]  ;;  %s1316_s28 = scalar_lea.hbm %s1752_s8, 32 }
  0x2e   : > { %477 = vmatpush.msra.mxu0 %v464_v4  ;;  %511 = vmatpush.xpose.msra.mxu1 %v451_v12  ;;  %v443_v26 = vld [vmem:[#allocation6 + $0x30] sm:$0xff]  ;;  %v442_v28 = vld [vmem:[#allocation6 + $0x28] sm:$0xff]  ;;  %v441_v29 = vld [vmem:[#allocation6 + $0x20] sm:$0xff] }
  0x2f   : > { %618 = vmatpush.msra.mxu2 %v450_v14  ;;  %v435_v27 = vld [vmem:[%s1605_s17 + $0x8] sm:$0xff]  ;;  %v440_v30 = vld [vmem:[#allocation6 + $0x18] sm:$0xff]  ;;  %v438_v33 = vld [vmem:[#allocation6 + $0x8] sm:$0xff] }
  0x30   : > { %478 = vmatpush.msra.mxu0 %v463_v5  ;;  %v439_v31 = vld [vmem:[#allocation6 + $0x10] sm:$0xff]  ;;  %v436_v32 = vld [vmem:[%s1605_s17 + $0x10] sm:$0x3]  ;;  %v437_v34 = vld [vmem:[#allocation6] sm:$0xff]  ;;  %s863_s17 = sshll.u32 %s860_s11, 4  ;;  %s864_s17 = int_to_ptr.hbm [resolvable:$true] %s863_s17 }
  0x31   : > { %619 = vmatpush.msra.mxu2 %v449_v16  ;;  %v1202_v35 = vld [vmem:[%s1746_s2] ss:$0 sm:$0xff]  ;;  %s1310_s21 = sshra.s32 %s864_s17, 4  ;;  %s1311_s21 = int_to_ptr.hbm [resolvable:$true] %s1310_s21 }
  0x32   : > { %479 = vmatpush.msra.mxu0 %v462_v6  ;;  %512 = vmatpush.xpose.msra.mxu1 %v450_v14  ;;  %v1203_v49 = vld [vmem:[%s1748_s4] ss:$0 sm:$0xff]  ;;  %s1312_s25 = scalar_lea.hbm %s1311_s21, 16  ;;  %p1317_p5 = scmp.lt.s32.totalorder %s1311_s21, %s1752_s8 }
  0x33   : > { %620 = vmatpush.msra.mxu2 %v448_v18  ;;  %p1313_p1 = scmp.ne.s32.totalorder %s1311_s21, %s1312_s25  ;;  %p1318_p6 = scmp.lt.s32.totalorder %s1316_s28, %s1312_s25 }
  0x34   : > { %480 = vmatpush.msra.mxu0 %v461_v7 }
  0x35   : > { %621 = vmatpush.msra.mxu2 %v447_v20  ;;  %p1314_p2 = pnand %p1313_p1, %p1545_p4  ;;  %p1319_p7 = por %p1318_p6, %p1317_p5 }
  0x36   : > { %481 = vmatpush.msra.mxu0 %v460_v8  ;;  %513 = vmatpush.xpose.msra.mxu1 %v449_v16 }
  0x37   : > { %622 = vmatpush.msra.mxu2 %v446_v23  ;;  %p1315_p3 = pneg %p1314_p2 }
  0x38   : > { %482 = vmatpush.msra.mxu0 %v459_v9 }
  0x39   : > { %623 = vmatpush.msra.mxu2 %v445_v24  ;;  %p1320_p9 = pnand %p1319_p7, %p1315_p3 }
  0x3a   : > { %483 = vmatpush.msra.mxu0 %v458_v11  ;;  %514 = vmatpush.xpose.msra.mxu1 %v448_v18 }
  0x3b   : > { %624 = vmatpush.msra.mxu2 %v444_v25 }
  0x3c   : > { %484 = vmatpush.msra.mxu0 %v457_v13 }
  0x3d   : > { %625 = vmatpush.msra.mxu2 %v443_v26 }
  0x3e   : > { %485 = vmatpush.msra.mxu0 %v456_v15  ;;  %515 = vmatpush.xpose.msra.mxu1 %v447_v20 }
  0x3f   : > { %626 = vmatpush.msra.mxu2 %v442_v28 }
  0x40   : > { %486 = vmatpush.msra.mxu0 %v455_v17 }
  0x41   : > { %627 = vmatpush.msra.mxu2 %v441_v29 }
  0x42   : > { %487 = vmatpush.msra.mxu0 %v454_v19  ;;  %516 = vmatpush.xpose.msra.mxu1 %v446_v23 }
  0x43   : > { %628 = vmatpush.msra.mxu2 %v440_v30 }
  0x44   : > { %488 = vmatpush.msra.mxu0 %v453_v21 }
  0x45   : > { %489 = vmatmul.f32.vlgmr.msra.gmra.mxu0 %v434_v22  ;;  %629 = vmatpush.msra.mxu2 %v439_v31 }
  0x46   : > { %517 = vmatpush.xpose.msra.mxu1 %v445_v24 }
  0x47   : > { %630 = vmatpush.msra.mxu2 %v438_v33 }
  0x49   : > { %631 = vmatpush.msra.mxu2 %v437_v34 }
  0x4a   : > { %518 = vmatpush.xpose.msra.mxu1 %v444_v25 }
  0x4d   : > { %492 = vmatmul.f32.gmra.mxu0 %v435_v27  ;;  %v708_v27 = vld [vmem:[#allocation8 + $0x70] sm:$0xff] }
  0x4e   : > { %519 = vmatpush.xpose.msra.mxu1 %v443_v26  ;;  %v709_v26 = vld [vmem:[#allocation8 + $0x78] sm:$0xff] }
  0x4f   : > { %746 = vmatpush.msra.mxu3 %v709_v26  ;;  %v726_v26 = vld [vmem:[#allocation8 + $0x100] sm:$0xff] }
  0x51   : > { %747 = vmatpush.msra.mxu3 %v708_v27  ;;  %v643_v27 = vshrl.u32 %v549_v63, 7 }
  0x52   : > { %520 = vmatpush.xpose.msra.mxu1 %v442_v28  ;;  %v725_v28 = vld [vmem:[#allocation8 + $0xf8] sm:$0xff] }
  0x53   : > { %769 = vmatpush.msrb.mxu0 %v725_v28  ;;  %vm647_vm10 = vcmp.gt.s32.totalorder %v643_v27, 0 }
  0x55   : > { %495 = vmatmul.f32.gmra.mxu0 %v436_v32  ;;  %v740_v32 = vld [vmem:[#allocation8 + $0x170] sm:$0xff] }
  0x56   : > { %521 = vmatpush.xpose.msra.mxu1 %v441_v29  ;;  %v741_v29 = vld [vmem:[#allocation8 + $0x178] sm:$0xff] }
  0x57   : > { %792 = vmatpush.msrb.mxu2 %v741_v29 }
  0x59   : > { %793 = vmatpush.msrb.mxu2 %v740_v32 }
  0x5a   : > { %522 = vmatpush.xpose.msra.mxu1 %v440_v30  ;;  %v707_v30 = vld [vmem:[#allocation8 + $0x68] sm:$0xff] }
  0x5b   : > { %748 = vmatpush.msra.mxu3 %v707_v30 }
  0x5e   : > { %523 = vmatpush.xpose.msra.mxu1 %v439_v31  ;;  %v724_v31 = vld [vmem:[#allocation8 + $0xf0] sm:$0xff] }
  0x5f   : > { %770 = vmatpush.msrb.mxu0 %v724_v31  ;;  %v645_v31 = vadd.s32 16, %v643_v27 }
  0x61   : > { %vm659_vm11 = vcmp.lt.s32.totalorder %v645_v31, 17 }
  0x62   : > { %524 = vmatpush.xpose.msra.mxu1 %v438_v33  ;;  %v723_v33 = vld [vmem:[#allocation8 + $0xe8] sm:$0xff] }
  0x63   : > { %771 = vmatpush.msrb.mxu0 %v723_v33 }
  0x66   : > { %525 = vmatpush.xpose.msra.mxu1 %v437_v34  ;;  %v739_v34 = vld [vmem:[#allocation8 + $0x168] sm:$0xff] }
  0x67   : > { %794 = vmatpush.msrb.mxu2 %v739_v34 }
  0xc2   : > { %v490_v36 = vpop.f32.mrf.mxu0 }
  0xc3   : > { %v491_v37 = vadd.f32 %v1202_v35, %v490_v36 }
  0xc5   : > { %681 = vst [vmem:[%s1619_s27 - $0x1] sm:$0xfe] %v491_v37  ;;  %526 = vmatmul.f32.vlgmr.msra.gmra.mxu1 %v491_v37  ;;  %v499_v38 = vmul.f32 %v491_v37, %v491_v37  ;;  %v722_v37 = vld [vmem:[#allocation8 + $0xe0] sm:$0xff] }
  0xc6   : > { %772 = vmatpush.msrb.mxu0 %v722_v37 }
  0xc7   : > { %502 = vadd.xlane.f32.xlu0 %v499_v38  ;;  %v738_v38 = vld [vmem:[#allocation8 + $0x160] sm:$0xff] }
  0xc8   : > { %795 = vmatpush.msrb.mxu2 %v738_v38 }
  0xca   : > { %v493_v39 = vpop.f32.mrf.mxu0 }
  0xcb   : > { %v494_v40 = vadd.f32 %v1202_v35, %v493_v39  ;;  %v705_v39 = vld [vmem:[#allocation8 + $0x58] sm:$0xff] }
  0xcd   : > { %682 = vst [vmem:[%s1619_s27 + $0x7] sm:$0xff] %v494_v40  ;;  %529 = vmatmul.f32.gmra.mxu1 %v494_v40  ;;  %v500_v41 = vmul.f32 %v494_v40, %v494_v40  ;;  %v721_v40 = vld [vmem:[#allocation8 + $0xd8] sm:$0xff] }
  0xce   : > { %773 = vmatpush.msrb.mxu0 %v721_v40 }
  0xcf   : > { %504 = vadd.xlane.f32.xlu0 %v500_v41  ;;  %v737_v41 = vld [vmem:[#allocation8 + $0x158] sm:$0xff] }
  0xd0   : > { %796 = vmatpush.msrb.mxu2 %v737_v41 }
  0xd2   : > { %v496_v42 = vpop.f32.mrf.mxu0 }
  0xd3   : > { %v497_v43 = vadd.f32 %v1202_v35, %v496_v42  ;;  %v706_v35 = vld [vmem:[#allocation8 + $0x60] sm:$0xff] }
  0xd4   : > { %749 = vmatpush.msra.mxu3 %v706_v35 }
  0xd5   : > { %683 = vst [vmem:[%s1619_s27 + $0xf] sm:$0x1] %v497_v43  ;;  %532 = vmatmul.f32.gmra.mxu1 %v497_v43  ;;  %v501_v44 = vmul.f32 %v497_v43, %v497_v43  ;;  %v704_v43 = vld [vmem:[#allocation8 + $0x50] sm:$0xff] }
  0xd6   : > { %750 = vmatpush.msra.mxu3 %v705_v39 }
  0xd7   : > { %v507_v45 = vsel %vm506_vm0, %v501_v44, 0.0 }
  0xd8   : > { %508 = vadd.xlane.f32.xlu1 %v507_v45  ;;  %751 = vmatpush.msra.mxu3 %v704_v43 }
 0x13a   : > { %v503_v46 = vpop.xlane.xlu0 %502 }
 0x142   : > { %v527_v47 = vpop.f32.mrf.mxu1  ;;  %v505_v54 = vpop.xlane.xlu0 %504 }
 0x143   : > { %v536_v48 = vmul.f32 2.0, %v527_v47  ;;  %v736_v47 = vld [vmem:[#allocation8 + $0x150] sm:$0xff] }
 0x144   : > { %797 = vmatpush.msrb.mxu2 %v736_v47 }
 0x145   : > { %v539_v50 = vsub.f32 %v503_v46, %v536_v48  ;;  %v720_v46 = vld [vmem:[#allocation8 + $0xd0] sm:$0xff]  ;;  %v703_v48 = vld [vmem:[#allocation8 + $0x48] sm:$0xff] }
 0x146   : > { %774 = vmatpush.msrb.mxu0 %v720_v46  ;;  %752 = vmatpush.msra.mxu3 %v703_v48 }
 0x147   : > { %v546_v51 = vadd.f32 %v1203_v49, %v539_v50  ;;  %v719_v50 = vld [vmem:[#allocation8 + $0xc8] sm:$0xff] }
 0x148   : > { %775 = vmatpush.msrb.mxu0 %v719_v50 }
 0x149   : > { %551 = vmin.xlane.f32.xlu1 %v546_v51 }
 0x14a   : > { %v530_v52 = vpop.f32.mrf.mxu1 }
 0x14b   : > { %v537_v53 = vmul.f32 2.0, %v530_v52  ;;  %v509_v59 = vpop.xlane.xlu1 %508  ;;  %v735_v52 = vld [vmem:[#allocation8 + $0x148] sm:$0xff] }
 0x14c   : > { %798 = vmatpush.msrb.mxu2 %v735_v52 }
 0x14d   : > { %v540_v55 = vsub.f32 %v505_v54, %v537_v53  ;;  %v1449_v54 = vmov 1.0  }
 0x14f   : > { %v547_v56 = vadd.f32 %v1203_v49, %v540_v55  ;;  %v701_v55 = vld [vmem:[#allocation8 + $0x38] sm:$0xff] }
 0x151   : > { %553 = vmin.xlane.f32.xlu2 %v547_v56 }
 0x152   : > { %v533_v57 = vpop.f32.mrf.mxu1 }
 0x153   : > { %v538_v58 = vmul.f32 2.0, %v533_v57  ;;  %v700_v57 = vld [vmem:[#allocation8 + $0x30] sm:$0xff] }
 0x155   : > { %v541_v60 = vsub.f32 %v509_v59, %v538_v58 }
 0x157   : > { %v548_v61 = vadd.f32 %v1203_v49, %v541_v60  ;;  %v699_v60 = vld [vmem:[#allocation8 + $0x28] sm:$0xff] }
 0x159   : > { %v555_v62 = vsel %vm506_vm0, %v548_v61, inf }
 0x15a   : > { %556 = vmin.xlane.f32.xlu2 %v555_v62 }
 0x1bc   : > { %v552_v1 = vpop.xlane.xlu1 %551 }
 0x1bd   : > { %vm558_vm1 = vcmp.le.f32.partialorder %v546_v51, %v552_v1  ;;  %v702_v51 = vld [vmem:[#allocation8 + $0x40] sm:$0xff] }
 0x1be   : > { %v561_v2 = vsel %vm558_vm1, %v1630_v0, 128  ;;  %753 = vmatpush.msra.mxu3 %v702_v51 }
 0x1bf   : > { %v565_v3 = vshra.s32 %v561_v2, 16  ;;  %v564_v14 = vand.u32 65535, %v561_v2 }
 0x1c0   : > { %754 = vmatpush.msra.mxu3 %v701_v55 }
 0x1c1   : > { %v567_v4 = vcvt.s32.f32 %v565_v3  ;;  %v566_v16 = vcvt.s32.f32 %v564_v14  ;;  %v732_v14 = vld [vmem:[#allocation8 + $0x130] sm:$0xff] }
 0x1c2   : > { %755 = vmatpush.msra.mxu3 %v700_v57 }
 0x1c3   : > { %568 = vmin.xlane.f32.xlu0 %v567_v4 }
 0x1c4   : > { %v554_v5 = vpop.xlane.xlu2 %553  ;;  %756 = vmatpush.msra.mxu3 %v699_v60 }
 0x1c5   : > { %vm559_vm2 = vcmp.le.f32.partialorder %v547_v56, %v554_v5  ;;  %v698_v5 = vld [vmem:[#allocation8 + $0x20] sm:$0xff] }
 0x1c6   : > { %v562_v6 = vsel %vm559_vm2, %v1630_v0, 128  ;;  %757 = vmatpush.msra.mxu3 %v698_v5 }
 0x1c7   : > { %v579_v7 = vshra.s32 %v562_v6, 16  ;;  %v578_v18 = vand.u32 65535, %v562_v6  ;;  %v697_v6 = vld [vmem:[#allocation8 + $0x18] sm:$0xff] }
 0x1c8   : > { %758 = vmatpush.msra.mxu3 %v697_v6 }
 0x1c9   : > { %v581_v8 = vcvt.s32.f32 %v579_v7  ;;  %v580_v20 = vcvt.s32.f32 %v578_v18  ;;  %v696_v7 = vld [vmem:[#allocation8 + $0x10] sm:$0xff]  ;;  %v730_v18 = vld [vmem:[#allocation8 + $0x120] sm:$0xff] }
 0x1ca   : > { %759 = vmatpush.msra.mxu3 %v696_v7 }
 0x1cb   : > { %582 = vmin.xlane.f32.xlu1 %v581_v8 }
 0x1cd   : > { %v557_v9 = vpop.xlane.xlu2 %556 }
 0x1ce   : > { %vm560_vm3 = vcmp.le.f32.partialorder %v548_v61, %v557_v9  ;;  %v718_v9 = vld [vmem:[#allocation8 + $0xc0] sm:$0xff] }
 0x1cf   : > { %v563_v10 = vsel %vm560_vm3, %v1630_v0, 128  ;;  %776 = vmatpush.msrb.mxu0 %v718_v9 }
 0x1d0   : > { %v592_v11 = vsel %vm506_vm0, %v563_v10, 2147483647  ;;  %v734_v10 = vld [vmem:[#allocation8 + $0x140] sm:$0xff] }
 0x1d1   : > { %v594_v12 = vshra.s32 %v592_v11, 16  ;;  %v593_v22 = vand.u32 65535, %v592_v11  ;;  %799 = vmatpush.msrb.mxu2 %v734_v10  ;;  %v694_v11 = vld [vmem:[#allocation8] sm:$0xff] }
 0x1d3   : > { %v596_v13 = vcvt.s32.f32 %v594_v12  ;;  %v595_v24 = vcvt.s32.f32 %v593_v22  ;;  %v717_v12 = vld [vmem:[#allocation8 + $0xb8] sm:$0xff]  ;;  %v728_v22 = vld [vmem:[#allocation8 + $0x110] sm:$0xff] }
 0x1d4   : > { %777 = vmatpush.msrb.mxu0 %v717_v12 }
 0x1d5   : > { %597 = vmin.xlane.f32.xlu2 %v596_v13 }
 0x236   : > { %v569_v15 = vpop.xlane.xlu0 %568 }
 0x237   : > { %vm570_vm4 = vcmp.eq.f32.partialorder %v567_v4, %v569_v15  ;;  %v575_v36 = vcvt.f32.s32 %v569_v15  ;;  %v715_v15 = vld [vmem:[#allocation8 + $0xa8] sm:$0xff] }
 0x238   : > { %v571_v17 = vsel %vm570_vm4, %v566_v16, inf  ;;  %v731_v16 = vld [vmem:[#allocation8 + $0x128] sm:$0xff] }
 0x239   : > { %572 = vmin.xlane.f32.xlu0 %v571_v17  ;;  %v576_v44 = vshll.u32 %v575_v36, 16  ;;  %v714_v17 = vld [vmem:[#allocation8 + $0xa0] sm:$0xff] }
 0x23e   : > { %v1636_v19 = vpop.xlane.xlu1 %582 }
 0x23f   : > { %vm584_vm5 = vcmp.eq.f32.partialorder %v581_v8, %v1636_v19  ;;  %v589_v53 = vcvt.f32.s32 %v1636_v19  ;;  %v695_v8 = vld [vmem:[#allocation8 + $0x8] sm:$0xff]  ;;  %v713_v19 = vld [vmem:[#allocation8 + $0x98] sm:$0xff] }
 0x240   : > { %v585_v21 = vsel %vm584_vm5, %v580_v20, inf  ;;  %760 = vmatpush.msra.mxu3 %v695_v8  ;;  %v729_v20 = vld [vmem:[#allocation8 + $0x118] sm:$0xff] }
 0x241   : > { %586 = vmin.xlane.f32.xlu1 %v585_v21  ;;  %v590_v58 = vshll.u32 %v589_v53, 16  ;;  %v712_v21 = vld [vmem:[#allocation8 + $0x90] sm:$0xff] }
 0x242   : > { %761 = vmatpush.msra.mxu3 %v694_v11 }
 0x248   : > { %v1639_v23 = vpop.xlane.xlu2 %597 }
 0x249   : > { %vm599_vm6 = vcmp.eq.f32.partialorder %v596_v13, %v1639_v23  ;;  %v604_v62 = vcvt.f32.s32 %v1639_v23  ;;  %v733_v13 = vld [vmem:[#allocation8 + $0x138] sm:$0xff]  ;;  %v711_v23 = vld [vmem:[#allocation8 + $0x88] sm:$0xff] }
 0x24a   : > { %v600_v25 = vsel %vm599_vm6, %v595_v24, inf  ;;  %800 = vmatpush.msrb.mxu2 %v733_v13  ;;  %v727_v24 = vld [vmem:[#allocation8 + $0x108] sm:$0xff] }
 0x24b   : > { %601 = vmin.xlane.f32.xlu2 %v600_v25  ;;  %v605_v2 = vshll.u32 %v604_v62, 16  ;;  %v710_v25 = vld [vmem:[#allocation8 + $0x80] sm:$0xff] }
 0x24c   : > { %801 = vmatpush.msrb.mxu2 %v732_v14 }
 0x24e   : > { %802 = vmatpush.msrb.mxu2 %v731_v16 }
 0x250   : > { %803 = vmatpush.msrb.mxu2 %v730_v18 }
 0x252   : > { %804 = vmatpush.msrb.mxu2 %v729_v20 }
 0x254   : > { %805 = vmatpush.msrb.mxu2 %v728_v22 }
 0x256   : > { %806 = vmatpush.msrb.mxu2 %v727_v24 }
 0x258   : > { %807 = vmatpush.msrb.mxu2 %v726_v26 }
 0x2ac   : > { %v573_v42 = vpop.xlane.xlu0 %572 }
 0x2ad   : > { %v574_v45 = vcvt.f32.s32 %v573_v42 }
 0x2af   : > { %v577_v49 = vadd.s32 %v576_v44, %v574_v45 }
 0x2b1   : > { %vm607_vm7 = vcmp.eq.s32.totalorder %v1630_v0, %v577_v49 }
 0x2b2   : > { %1083 = vmatmul.msk.f32.vlgmr.msra.gmra.mxu2 %vm607_vm7, %v1449_v54 }
 0x2b4   : > { %v587_v56 = vpop.xlane.xlu1 %586 }
 0x2b5   : > { %v588_v59 = vcvt.f32.s32 %v587_v56 }
 0x2b7   : > { %v591_v61 = vadd.s32 %v590_v58, %v588_v59 }
 0x2b9   : > { %vm608_vm8 = vcmp.eq.s32.totalorder %v1630_v0, %v591_v61 }
 0x2ba   : > { %1084 = vmatmul.msk.f32.gmra.mxu2 %vm608_vm8, %v1449_v54 }
 0x2be   : > { %v602_v1 = vpop.xlane.xlu2 %601 }
 0x2bf   : > { %v603_v3 = vcvt.f32.s32 %v602_v1 }
 0x2c1   : > { %v606_v4 = vadd.s32 %v605_v2, %v603_v3 }
 0x2c3   : > { %vm609_vm9 = vcmp.eq.s32.totalorder %v1630_v0, %v606_v4  ;;  %v716_v0 = vld [vmem:[#allocation8 + $0xb0] sm:$0xff] }
 0x2c4   : > { %1085 = vmatmul.msk.f32.gmra.mxu2 %vm609_vm9, %v1449_v54  ;;  %778 = vmatpush.msrb.mxu0 %v716_v0 }
 0x2c6   : > { %779 = vmatpush.msrb.mxu0 %v715_v15 }
 0x2c8   : > { %780 = vmatpush.msrb.mxu0 %v714_v17 }
 0x2ca   : > { %781 = vmatpush.msrb.mxu0 %v713_v19 }
 0x2cc   : > { %782 = vmatpush.msrb.mxu0 %v712_v21 }
 0x2ce   : > { %783 = vmatpush.msrb.mxu0 %v711_v23 }
 0x2d0   : > { %784 = vmatpush.msrb.mxu0 %v710_v25 }
 0x335   : > { %v633_v28 = vpop.f32.mrf.mxu2 }
 0x336   : > { %v675_v29 = vsel %vm647_vm10, %v633_v28, 0.0  ;;  %1205 = vmatmul.msk.f32.vlgmr.msra.gmra.mxu3 %vm647_vm10, %v633_v28 }
 0x337   : > { %678 = vst [vmem:[#allocation2] sm:$0xff] %v675_v29 }
 0x33d   : > { %v636_v30 = vpop.f32.mrf.mxu2 }
 0x33e   : > { %679 = vst [vmem:[#allocation2 + $0x8] sm:$0xff] %v636_v30  ;;  %765 = vmatmul.f32.gmra.mxu3 %v636_v30 }
 0x345   : > { %v690_v32 = vld [vmem:[#allocation2 + $0x1] sm:$0xff] }
 0x346   : > { %v692_v33 = vld [vmem:[#allocation2 + $0x2] sm:$0xff]  ;;  %785 = vmatmul.f32.vlgmr.msrb.gmra.mxu0 %v690_v32  ;;  %686 = vst [vmem:[%s414_s20] sm:$0xff] %v690_v32 }
 0x347   : > { %808 = vmatmul.f32.vlgmr.msrb.gmra.mxu2 %v692_v33  ;;  %v639_v63 = vpop.f32.mrf.mxu2 }
 0x348   : > { %v677_v34 = vsel %vm659_vm11, %v639_v63, 0.0 }
 0x349   : > { %680 = vst [vmem:[#allocation2 + $0x10] sm:$0x3] %v677_v34 }
 0x350   : > { %v691_v35 = vld [vmem:[#allocation2 + $0x9] sm:$0xff] }
 0x351   : > { %v693_v36 = vld [vmem:[#allocation2 + $0xa] sm:$0xff]  ;;  %788 = vmatmul.f32.gmra.mxu0 %v691_v35  ;;  %687 = vst [vmem:[%s414_s20 + $0x8] sm:$0xff] %v691_v35 }
 0x352   : > { %811 = vmatmul.f32.gmra.mxu2 %v693_v36 }
 0x353   : > { %1323 = shalt.err (!%p1320_p9)
}
 0x354   : > { %s1450_s13 = smov 128   ;;  %s1451_s23 = smov 8  }
 0x355   : > { %1114 = dma.vmem_to_hbm [thread:$0]  (%p1545_p4), %s862_s16, 256, %s864_s17, %s1664_s12, %s1450_s13, %s1450_s13, %s1451_s23  }
 0x356   : > { %s1771_s26 = sshll.u32 %s1619_s27, 4  ;;  %s1338_s21 = sshra.s32 %s883_s18, 4  ;;  %s881_s26 = int_to_ptr.vmem [resolvable:$true] %s1771_s26  ;;  %s1339_s21 = int_to_ptr.hbm [resolvable:$true] %s1338_s21 }
 0x357   : > { %s1340_s25 = scalar_lea.hbm %s1339_s21, 16  ;;  %s1344_s20 = scalar_lea.hbm %s1753_s9, 32 }
 0x358   : > { %p1341_p10 = scmp.ne.s32.totalorder %s1339_s21, %s1340_s25  ;;  %p1345_p13 = scmp.lt.s32.totalorder %s1339_s21, %s1753_s9 }
 0x359   : > { %p1346_p0 = scmp.lt.s32.totalorder %s1344_s20, %s1340_s25 }
 0x35a   : > { %p1342_p11 = pnand %p1341_p10, %p1545_p4 }
 0x35b   : > { %p1347_p1 = por %p1346_p0, %p1345_p13 }
 0x35c   : > { %p1343_p12 = pneg %p1342_p11 }
 0x35e   : > { %p1348_p2 = pnand %p1347_p1, %p1343_p12 }
 0x360   : > { %1351 = shalt.err (!%p1348_p2)
}
 0x361   : > { %1115 = dma.vmem_to_hbm [thread:$0]  (%p1545_p4), %s881_s26, 256, %s883_s18, %s1664_s12, %s1450_s13, %s1450_s13, %s1451_s23  }
 0x362   : > { %v1204_v37 = vld [vmem:[%s1750_s6] ss:$0 sm:$0xff]  ;;  %s407_s17 = scalar_lea.vmem [#allocation9], %s1613_s22  ;;  %s841_s25 = scalar_lea.hbm %s1751_s7, %s1650_s24 }
 0x363   : > { %s842_s18 = sshll.u32 %s407_s17, 4  ;;  %s844_s12 = sshll.u32 %s841_s25, 4  ;;  %s843_s18 = int_to_ptr.vmem [resolvable:$true] %s842_s18  ;;  %s845_s12 = int_to_ptr.hbm [resolvable:$true] %s844_s12 }
 0x364   : > { %s1772_s26 = sand.u32 1, %s1426_s10   ;;  %s1366_s22 = sshra.s32 %s845_s12, 4  ;;  %s1367_s22 = int_to_ptr.hbm [resolvable:$true] %s1366_s22 }
 0x365   : > { %s818_s29 = scalar_lea.sflag [#allocation5], %s1772_s26  ;;  %s1368_s15 = scalar_lea.hbm %s1367_s22, 16 }
 0x366   : > { %p1369_p3 = scmp.ne.s32.totalorder %s1367_s22, %s1368_s15  ;;  %s1372_s28 = scalar_lea.hbm %s1751_s7, 32 }
 0x367   : > { %p1373_p7 = scmp.lt.s32.totalorder %s1367_s22, %s1751_s7  ;;  %p1374_p9 = scmp.lt.s32.totalorder %s1372_s28, %s1368_s15 }
 0x368   : > { %p1370_p5 = pnand %p1369_p3, %p1545_p4 }
 0x369   : > { %p1375_p10 = por %p1374_p9, %p1373_p7 }
 0x36a   : > { %p1371_p6 = pneg %p1370_p5 }
 0x36c   : > { %p1376_p11 = pnand %p1375_p10, %p1371_p6 }
 0x3b9   : > { %v763_v38 = vpop.f32.mrf.mxu3 }
 0x3ba   : > { %v764_v40 = vadd.f32 %v1204_v37, %v763_v38 }
 0x3c1   : > { %v766_v44 = vpop.f32.mrf.mxu3 }
 0x3c2   : > { %v767_v46 = vadd.f32 %v1204_v37, %v766_v44 }
 0x3c3   : > { %v786_v39 = vpop.f32.mrf.mxu0 }
 0x3c4   : > { %v787_v41 = vadd.f32 %v786_v39, %v764_v40 }
 0x3ca   : > { %v809_v42 = vpop.f32.mrf.mxu2 }
 0x3cb   : > { %v810_v43 = vadd.f32 %v809_v42, %v787_v41 }
 0x3cd   : > { %815 = vst [vmem:[%s407_s17] sm:$0xff] %v810_v43 }
 0x3ce   : > { %v789_v45 = vpop.f32.mrf.mxu0 }
 0x3cf   : > { %v790_v47 = vadd.f32 %v789_v45, %v767_v46 }
 0x3d5   : > { %v812_v48 = vpop.f32.mrf.mxu2 }
 0x3d6   : > { %v813_v49 = vadd.f32 %v812_v48, %v790_v47 }
 0x3d8   : > { %816 = vst [vmem:[%s407_s17 + $0x8] sm:$0xff] %v813_v49 }
 0x3d9   : > { %1379 = shalt.err (!%p1376_p11)
}
 0x3da   : > { %1113 = dma.vmem_to_hbm [thread:$0]  (%p1545_p4), %s843_s18, 256, %s845_s12, %s818_s29, %s1450_s13, %s1450_s13, %s1451_s23  }
 0x3db PF: > { %p1145_p12 = scmp.ge.s32.totalorder %s1442_s14, 2  ;;  %s897_s17 = sand.u32 1, %s1422_s30  }
 0x3dc   : > { %s898_s11 = scalar_lea.sflag [#allocation5], %s897_s17 }
 0x3dd   : > { %p1130_p13 = pnand %p1145_p12, %p1554_p8 }
 0x3df   : > { %p1131_p0 = pneg %p1130_p13 }
 0x3e1   : > { %1413 = dma.done.wait (%p1131_p0), %s898_s11, 256  }
 0x3e2   : > { %1415 = vsyncadd (%p1131_p0), %s898_s11, 4294967040  ;;  %s1774_s21 = sadd.s32 4294967294, %s1442_s14  }
 0x3e3   : > { %s907_s25 = sand.u32 1, %s1774_s21  }
 0x3e4   : > { %s908_s19 = scalar_lea.sflag [#allocation11], %s907_s25 }
 0x3e5   : > { %1417 = dma.done.wait (%p1131_p0), %s908_s19, 512  }
 0x3e6   : > { %1419 = vsyncadd (%p1131_p0), %s908_s19, 4294966784  ;;  %s28_s14 = sadd.s32 1, %s1442_s14   ;;  %s1775_s13 = sld [smem:[#allocation17_spill]] }
 0x3e7   : > { %p25_p4 = scmp.ge.s32.totalorder %s28_s14, 4   ;;  %s1776_s11 = sld [smem:[#allocation21_spill]] }
 0x3e8   : > { %s1777_s12 = sld [smem:[#allocation18_spill]]  ;;  %s1779_s30 = smov %s1426_s10 }
 0x3e9   : > { %s1778_s23 = sld [smem:[#allocation19_spill]] }
 0x3eb   :  { %27 = sbr.rel (!%p25_p4) target bundleno = 10 (0xa), region = 128 }
 0x3ec   : > { %s1780_s10 = smov %s1775_s13 }
 0x3ef   : > { %s1781_s13 = smov %s1778_s23 }
 0x3f0   :  { %924 = vsyncpa [#allocation4], 1 }
 0x3f1   :  { %926 = vsyncpa [#allocation4 + $0x1], 1 }
 0x3f2   :  { %927 = vsyncpa [#allocation7], 1 }
 0x3f3   :  { %928 = vsyncpa [#allocation5], 1 }
 0x3f4   :  { %930 = vsyncpa [#allocation5 + $0x1], 1 }
 0x3f5   :  { %931 = vsyncpa [#allocation11], 1 }
 0x3f6   :  { %933 = vsyncpa [#allocation11 + $0x1], 1 }

</bundles_post_ra>
